<compile_context>
chip_gen: v7x
topology: tpu7x:2x2x1
jax: 0.10.0
libtpu: 0.0.40
codegen_flags: <defaults>
</compile_context>

<pallas_src>
import jax
import jax.numpy as jnp
from jax.experimental import pallas as pl
from jax.experimental.pallas import tpu as pltpu


def _round_up(x, m):
    return ((x + m - 1) // m) * m


def fccube_kernel(alpha_ref,                      # SMEM scalar prefetch: (1,) f32
                  xT_ref,                         # (3, bt)  input tile, batch on lanes
                  w1_ref, b1_ref, w2_ref, b2_ref,
                  w3_ref, b3_ref, w4_ref, b4_ref,
                  o_ref):                         # (2, bt)  output tile
    act_dtype = xT_ref.dtype                      # f32 or bf16
    # (1,1) vector in the activation dtype -> broadcasts against (out, batch).
    alpha = jnp.full((1, 1), alpha_ref[0], jnp.float32).astype(act_dtype)

    def prelu(h):
        # PReLU(num_parameters=1): one alpha shared across all channels.
        return jnp.where(h >= 0, h, alpha * h)

    h = xT_ref[...]
    layers = ((w1_ref, b1_ref, True),
              (w2_ref, b2_ref, True),
              (w3_ref, b3_ref, True),
              (w4_ref, b4_ref, False))
    for w_ref, b_ref, activate in layers:         # unrolled at trace time
        # MXU matmul with f32 accumulation; operands stay in act_dtype
        # (bf16 operands go to the MXU natively, f32 is untouched).
        h = jnp.dot(w_ref[...], h, preferred_element_type=jnp.float32)
        # Single down-cast of the accumulator; bias-add + PReLU run in the
        # activation dtype (no-op cast for f32).
        h = h.astype(act_dtype) + b_ref[...]
        if activate:
            h = prelu(h)

    o_ref[...] = h.astype(o_ref.dtype)


def fccube_forward_t(xT, params, *, block_b=16384):
    """Fast path.  xT: (3, B) "batch on lanes".  Returns (2, B).

    Batch lives on the lane axis throughout, so every matmul has a full-width
    N dimension and the output store is lane-dense and unmasked.  No extra
    HBM passes are made unless B has to be padded to a tile multiple.
    """
    F, B = xT.shape
    assert F == 3
    assert block_b % 128 == 0, "batch tile must be a multiple of 128 (lanes)"

    # Compute/activation dtype: follow a bf16 input (MXU-native operands and
    # bf16 elementwise -- use on v6e/v7x); anything else runs in f32.
    cdt = jnp.bfloat16 if xT.dtype == jnp.bfloat16 else jnp.float32
    if xT.dtype != cdt:
        xT = xT.astype(cdt)

    # Batch tile: as large as block_b, but at least 128 and capped at ~half
    # the (128-rounded) batch so the grid has >= 2 steps whenever possible.
    b_tile = max(128, min(block_b, _round_up(pl.cdiv(B, 2), 128)))
    Bp = _round_up(B, b_tile)
    if Bp != B:
        xT = jnp.pad(xT, ((0, 0), (0, Bp - B)))   # only copy when padding needed

    # Params: cast once to the compute dtype (tiny arrays).  Weights keep the
    # PyTorch (out, in) layout; biases are (out, 1) columns so they broadcast
    # against the (out, batch) activations inside the kernel.
    ws = [params[f"w{i}"].astype(cdt) for i in (1, 2, 3, 4)]
    bs = [params[f"b{i}"].astype(cdt) for i in (1, 2, 3, 4)]
    alpha = params["alpha"].astype(jnp.float32)    # (1,) -> SMEM

    full = lambda arr: pl.BlockSpec(arr.shape, lambda i, a: (0, 0))

    out = pl.pallas_call(
        fccube_kernel,
        out_shape=jax.ShapeDtypeStruct((2, Bp), cdt),
        grid_spec=pltpu.PrefetchScalarGridSpec(
            num_scalar_prefetch=1,                 # alpha -> SMEM
            grid=(Bp // b_tile,),
            in_specs=[
                pl.BlockSpec((3, b_tile), lambda i, a: (0, i)),   # x^T tile
                full(ws[0]), full(bs[0]),
                full(ws[1]), full(bs[1]),
                full(ws[2]), full(bs[2]),
                full(ws[3]), full(bs[3]),
            ],
            out_specs=pl.BlockSpec((2, b_tile), lambda i, a: (0, i)),
        ),
        compiler_params=pltpu.CompilerParams(
            dimension_semantics=("parallel",),     # megacore sharding (v7x: 2 TCs)
            # ~260 B per batch element double-buffered => <10 MiB at the
            # default tile; fits the 32 MiB scoped limit on all generations
            # (v7x has only 64 MiB physical VMEM).  Raise only for block_b
            # beyond ~96k on the 128 MiB v5e/v6e parts.
            vmem_limit_bytes=32 * 1024 * 1024,
        ),
    )(alpha, xT, ws[0], bs[0], ws[1], bs[1], ws[2], bs[2], ws[3], bs[3])

    return out[:, :B] if Bp != B else out


def fccube_forward(x, params, *, block_b=16384):
    """PyTorch-layout drop-in: x (B, 3) -> (B, 2).

    The transposes here are pure layout plumbing for API compatibility; prefer
    fccube_forward_t when the surrounding graph can produce/consume the
    (feature, batch) layout to avoid the extra HBM passes.
    """
    return fccube_forward_t(x.T, params, block_b=block_b).T


def init_params(key):
    """Deterministic synthetic init matching nn.Linear shapes.

    Weights in PyTorch (out, in) layout; biases as (out, 1) columns.
    """
    dims = [(32, 3), (16, 32), (8, 16), (2, 8)]    # (fan_out, fan_in)
    params = {}
    for idx, (fan_out, fan_in) in enumerate(dims, start=1):
        key, kw, kb = jax.random.split(key, 3)
        bound = 1.0 / jnp.sqrt(fan_in)
        params[f"w{idx}"] = jax.random.uniform(
            kw, (fan_out, fan_in), jnp.float32, -bound, bound)
        params[f"b{idx}"] = jax.random.uniform(
            kb, (fan_out, 1), jnp.float32, -bound, bound)
    params["alpha"] = jnp.full((1,), 0.1, jnp.float32)   # PReLU init=0.1
    return params


def fccube_reference(x, p):
    a = p["alpha"][0]
    prelu = lambda h: jnp.where(h >= 0, h, a * h)
    h = prelu(x @ p["w1"].T + p["b1"][:, 0])
    h = prelu(h @ p["w2"].T + p["b2"][:, 0])
    h = prelu(h @ p["w3"].T + p["b3"][:, 0])
    return h @ p["w4"].T + p["b4"][:, 0]


if __name__ == "__main__":
    key = jax.random.PRNGKey(0)
    key, kx = jax.random.split(key)
    params = init_params(key)

    # 1) Tiny batch through the PyTorch-layout wrapper (single grid step).
    x_small = jax.random.normal(kx, (8, 3), jnp.float32)
    out_small = jax.block_until_ready(fccube_forward(x_small, params))
    ref_small = fccube_reference(x_small, params)
    assert out_small.shape == (8, 2)
    assert jnp.allclose(out_small, ref_small, atol=1e-4, rtol=1e-4)

    # 2) B > b_tile and B not a multiple of 128: multi-step grid + batch
    #    padding, via the fast transposed entry point (no wrapper transposes).
    key, kx2 = jax.random.split(key)
    B = 300
    x_big = jax.random.normal(kx2, (B, 3), jnp.float32)
    ref_big = fccube_reference(x_big, params)
    outT = jax.block_until_ready(
        fccube_forward_t(x_big.T, params, block_b=256))        # 2 grid steps
    assert outT.shape == (2, B)
    assert jnp.allclose(outT.T, ref_big, atol=1e-4, rtol=1e-4)

    # 3) bf16 operands + bf16 bias/PReLU (v6e/v7x fast path; still correct,
    #    just not faster, on v5e).
    outT_bf16 = jax.block_until_ready(
        fccube_forward_t(x_big.T.astype(jnp.bfloat16), params, block_b=256))
    assert outT_bf16.dtype == jnp.bfloat16
    assert jnp.allclose(outT_bf16.astype(jnp.float32).T, ref_big,
                        atol=5e-2, rtol=5e-2)

    print("KERNEL_OK")
</pallas_src>

<mosaic_0001>
module attributes {stable_mosaic.version = 11 : i64} {
  func.func @fccube_kernel(%arg0: i32, %arg1: memref<1xf32, #tpu.memory_space<smem>>, %arg2: memref<3x128xf32, #tpu.memory_space<vmem>>, %arg3: memref<32x3xf32, #tpu.memory_space<vmem>>, %arg4: memref<32x1xf32, #tpu.memory_space<vmem>>, %arg5: memref<16x32xf32, #tpu.memory_space<vmem>>, %arg6: memref<16x1xf32, #tpu.memory_space<vmem>>, %arg7: memref<8x16xf32, #tpu.memory_space<vmem>>, %arg8: memref<8x1xf32, #tpu.memory_space<vmem>>, %arg9: memref<2x8xf32, #tpu.memory_space<vmem>>, %arg10: memref<2x1xf32, #tpu.memory_space<vmem>>, %arg11: memref<2x128xf32, #tpu.memory_space<vmem>>) attributes {dimension_semantics = [#tpu.dimension_semantics<parallel>], iteration_bounds = array<i64: 1>, scalar_prefetch = 1 : i64, scratch_operands = 0 : i64, tpu.core_type = #tpu.core_type<tc>, window_params = [{transform_indices = @transform_0, window_bounds = array<i64: 3, 128>}, {pipeline_mode = #tpu.pipeline_mode<synchronous>, transform_indices = @transform_1, window_bounds = array<i64: 32, 3>}, {pipeline_mode = #tpu.pipeline_mode<synchronous>, transform_indices = @transform_2, window_bounds = array<i64: 32, 1>}, {pipeline_mode = #tpu.pipeline_mode<synchronous>, transform_indices = @transform_3, window_bounds = array<i64: 16, 32>}, {pipeline_mode = #tpu.pipeline_mode<synchronous>, transform_indices = @transform_4, window_bounds = array<i64: 16, 1>}, {pipeline_mode = #tpu.pipeline_mode<synchronous>, transform_indices = @transform_5, window_bounds = array<i64: 8, 16>}, {pipeline_mode = #tpu.pipeline_mode<synchronous>, transform_indices = @transform_6, window_bounds = array<i64: 8, 1>}, {pipeline_mode = #tpu.pipeline_mode<synchronous>, transform_indices = @transform_7, window_bounds = array<i64: 2, 8>}, {pipeline_mode = #tpu.pipeline_mode<synchronous>, transform_indices = @transform_8, window_bounds = array<i64: 2, 1>}, {transform_indices = @transform_9, window_bounds = array<i64: 2, 128>}]} {
    %c0 = arith.constant 0 : index
    %0 = memref.load %arg1[%c0] : memref<1xf32, #tpu.memory_space<smem>>
    %1 = vector.broadcast %0 : f32 to vector<1x1xf32>
    %c0_0 = arith.constant 0 : index
    %c0_1 = arith.constant 0 : index
    %2 = vector.load %arg2[%c0_0, %c0_1] : memref<3x128xf32, #tpu.memory_space<vmem>>, vector<3x128xf32>
    %c0_2 = arith.constant 0 : index
    %c0_3 = arith.constant 0 : index
    %3 = vector.load %arg3[%c0_2, %c0_3] : memref<32x3xf32, #tpu.memory_space<vmem>>, vector<32x3xf32>
    %cst = arith.constant dense<0.000000e+00> : vector<32x128xf32>
    %4 = tpu.matmul %3, %2, %cst {dimension_numbers = #tpu.dot_dimension_numbers<[1], [0], [0], [1], [0, 0, 1, 1], [], []>} : vector<32x3xf32>, vector<3x128xf32>, vector<32x128xf32> -> vector<32x128xf32>
    %c0_4 = arith.constant 0 : index
    %c0_5 = arith.constant 0 : index
    %5 = vector.load %arg4[%c0_4, %c0_5] : memref<32x1xf32, #tpu.memory_space<vmem>>, vector<32x1xf32>
    %6 = vector.broadcast %5 : vector<32x1xf32> to vector<32x128xf32>
    %7 = arith.addf %4, %6 : vector<32x128xf32>
    %cst_6 = arith.constant 0.000000e+00 : f32
    %8 = vector.broadcast %cst_6 : f32 to vector<32x128xf32>
    %9 = arith.cmpf oge, %7, %8 : vector<32x128xf32>
    %10 = vector.broadcast %1 : vector<1x1xf32> to vector<32x128xf32>
    %11 = arith.mulf %10, %7 : vector<32x128xf32>
    %12 = arith.select %9, %7, %11 : vector<32x128xi1>, vector<32x128xf32>
    %c0_7 = arith.constant 0 : index
    %c0_8 = arith.constant 0 : index
    %13 = vector.load %arg5[%c0_7, %c0_8] : memref<16x32xf32, #tpu.memory_space<vmem>>, vector<16x32xf32>
    %cst_9 = arith.constant dense<0.000000e+00> : vector<16x128xf32>
    %14 = tpu.matmul %13, %12, %cst_9 {dimension_numbers = #tpu.dot_dimension_numbers<[1], [0], [0], [1], [0, 0, 1, 1], [], []>} : vector<16x32xf32>, vector<32x128xf32>, vector<16x128xf32> -> vector<16x128xf32>
    %c0_10 = arith.constant 0 : index
    %c0_11 = arith.constant 0 : index
    %15 = vector.load %arg6[%c0_10, %c0_11] : memref<16x1xf32, #tpu.memory_space<vmem>>, vector<16x1xf32>
    %16 = vector.broadcast %15 : vector<16x1xf32> to vector<16x128xf32>
    %17 = arith.addf %14, %16 : vector<16x128xf32>
    %cst_12 = arith.constant 0.000000e+00 : f32
    %18 = vector.broadcast %cst_12 : f32 to vector<16x128xf32>
    %19 = arith.cmpf oge, %17, %18 : vector<16x128xf32>
    %20 = vector.broadcast %1 : vector<1x1xf32> to vector<16x128xf32>
    %21 = arith.mulf %20, %17 : vector<16x128xf32>
    %22 = arith.select %19, %17, %21 : vector<16x128xi1>, vector<16x128xf32>
    %c0_13 = arith.constant 0 : index
    %c0_14 = arith.constant 0 : index
    %23 = vector.load %arg7[%c0_13, %c0_14] : memref<8x16xf32, #tpu.memory_space<vmem>>, vector<8x16xf32>
    %cst_15 = arith.constant dense<0.000000e+00> : vector<8x128xf32>
    %24 = tpu.matmul %23, %22, %cst_15 {dimension_numbers = #tpu.dot_dimension_numbers<[1], [0], [0], [1], [0, 0, 1, 1], [], []>} : vector<8x16xf32>, vector<16x128xf32>, vector<8x128xf32> -> vector<8x128xf32>
    %c0_16 = arith.constant 0 : index
    %c0_17 = arith.constant 0 : index
    %25 = vector.load %arg8[%c0_16, %c0_17] : memref<8x1xf32, #tpu.memory_space<vmem>>, vector<8x1xf32>
    %26 = vector.broadcast %25 : vector<8x1xf32> to vector<8x128xf32>
    %27 = arith.addf %24, %26 : vector<8x128xf32>
    %cst_18 = arith.constant 0.000000e+00 : f32
    %28 = vector.broadcast %cst_18 : f32 to vector<8x128xf32>
    %29 = arith.cmpf oge, %27, %28 : vector<8x128xf32>
    %30 = vector.broadcast %1 : vector<1x1xf32> to vector<8x128xf32>
    %31 = arith.mulf %30, %27 : vector<8x128xf32>
    %32 = arith.select %29, %27, %31 : vector<8x128xi1>, vector<8x128xf32>
    %c0_19 = arith.constant 0 : index
    %c0_20 = arith.constant 0 : index
    %33 = vector.load %arg9[%c0_19, %c0_20] : memref<2x8xf32, #tpu.memory_space<vmem>>, vector<2x8xf32>
    %cst_21 = arith.constant dense<0.000000e+00> : vector<2x128xf32>
    %34 = tpu.matmul %33, %32, %cst_21 {dimension_numbers = #tpu.dot_dimension_numbers<[1], [0], [0], [1], [0, 0, 1, 1], [], []>} : vector<2x8xf32>, vector<8x128xf32>, vector<2x128xf32> -> vector<2x128xf32>
    %c0_22 = arith.constant 0 : index
    %c0_23 = arith.constant 0 : index
    %35 = vector.load %arg10[%c0_22, %c0_23] : memref<2x1xf32, #tpu.memory_space<vmem>>, vector<2x1xf32>
    %36 = vector.broadcast %35 : vector<2x1xf32> to vector<2x128xf32>
    %37 = arith.addf %34, %36 : vector<2x128xf32>
    %c0_24 = arith.constant 0 : index
    %c0_25 = arith.constant 0 : index
    %38 = vector.load %arg11[%c0_24, %c0_25] : memref<2x128xf32, #tpu.memory_space<vmem>>, vector<2x128xf32>
    tpu.vector_store %arg11[%c0_24, %c0_25], %37 {strides = array<i32>} : memref<2x128xf32, #tpu.memory_space<vmem>>, vector<2x128xf32>,
    return
  }
  func.func @transform_0(%arg0: i32, %arg1: memref<1xf32, #tpu.memory_space<smem>>) -> (i32, i32) {
    %c0_i32 = arith.constant 0 : i32
    %c0_i32_0 = arith.constant 0 : i32
    return %c0_i32, %arg0 : i32, i32
  }
  func.func @transform_1(%arg0: i32, %arg1: memref<1xf32, #tpu.memory_space<smem>>) -> (i32, i32) {
    %c0_i32 = arith.constant 0 : i32
    %c0_i32_0 = arith.constant 0 : i32
    %c0_i32_1 = arith.constant 0 : i32
    return %c0_i32, %c0_i32_0 : i32, i32
  }
  func.func @transform_2(%arg0: i32, %arg1: memref<1xf32, #tpu.memory_space<smem>>) -> (i32, i32) {
    %c0_i32 = arith.constant 0 : i32
    %c0_i32_0 = arith.constant 0 : i32
    %c0_i32_1 = arith.constant 0 : i32
    return %c0_i32, %c0_i32_0 : i32, i32
  }
  func.func @transform_3(%arg0: i32, %arg1: memref<1xf32, #tpu.memory_space<smem>>) -> (i32, i32) {
    %c0_i32 = arith.constant 0 : i32
    %c0_i32_0 = arith.constant 0 : i32
    %c0_i32_1 = arith.constant 0 : i32
    return %c0_i32, %c0_i32_0 : i32, i32
  }
  func.func @transform_4(%arg0: i32, %arg1: memref<1xf32, #tpu.memory_space<smem>>) -> (i32, i32) {
    %c0_i32 = arith.constant 0 : i32
    %c0_i32_0 = arith.constant 0 : i32
    %c0_i32_1 = arith.constant 0 : i32
    return %c0_i32, %c0_i32_0 : i32, i32
  }
  func.func @transform_5(%arg0: i32, %arg1: memref<1xf32, #tpu.memory_space<smem>>) -> (i32, i32) {
    %c0_i32 = arith.constant 0 : i32
    %c0_i32_0 = arith.constant 0 : i32
    %c0_i32_1 = arith.constant 0 : i32
    return %c0_i32, %c0_i32_0 : i32, i32
  }
  func.func @transform_6(%arg0: i32, %arg1: memref<1xf32, #tpu.memory_space<smem>>) -> (i32, i32) {
    %c0_i32 = arith.constant 0 : i32
    %c0_i32_0 = arith.constant 0 : i32
    %c0_i32_1 = arith.constant 0 : i32
    return %c0_i32, %c0_i32_0 : i32, i32
  }
  func.func @transform_7(%arg0: i32, %arg1: memref<1xf32, #tpu.memory_space<smem>>) -> (i32, i32) {
    %c0_i32 = arith.constant 0 : i32
    %c0_i32_0 = arith.constant 0 : i32
    %c0_i32_1 = arith.constant 0 : i32
    return %c0_i32, %c0_i32_0 : i32, i32
  }
  func.func @transform_8(%arg0: i32, %arg1: memref<1xf32, #tpu.memory_space<smem>>) -> (i32, i32) {
    %c0_i32 = arith.constant 0 : i32
    %c0_i32_0 = arith.constant 0 : i32
    %c0_i32_1 = arith.constant 0 : i32
    return %c0_i32, %c0_i32_0 : i32, i32
  }
  func.func @transform_9(%arg0: i32, %arg1: memref<1xf32, #tpu.memory_space<smem>>) -> (i32, i32) {
    %c0_i32 = arith.constant 0 : i32
    %c0_i32_0 = arith.constant 0 : i32
    return %c0_i32, %arg0 : i32, i32
  }
}

</mosaic_0001>

<bundles_post_ra>
// kernel: tpu_custom_call.1
= control target key start
LH: loop header
LB: loop body
LE: loop exit
PB: predicated region body
PF: predicated region fallthrough
CT: control target
= control target key end

     0   :  { %vm78_vm0 = vcmask 1042432   ;;  %vm65_vm1 = vcmask 23552   ;;  %v560_v5 = vmov 0   ;;  %s692_s0 = inlined_call_operand.<no memory space> [shape: f32[1], index: 0, kind: input, shape index: {}]   ;;  %s693_s1 = inlined_call_operand.vmem [shape: f32[3,128], index: 1, kind: input, shape index: {}]   ;;  %s694_s2 = inlined_call_operand.vmem [shape: f32[32,3], index: 2, kind: input, shape index: {}]   ;;  %s695_s3 = inlined_call_operand.vmem [shape: f32[32,1], index: 3, kind: input, shape index: {}]   ;;  %s696_s4 = inlined_call_operand.vmem [shape: f32[16,32], index: 4, kind: input, shape index: {}]   ;;  %s697_s5 = inlined_call_operand.vmem [shape: f32[16,1], index: 5, kind: input, shape index: {}]   ;;  %s698_s6 = inlined_call_operand.vmem [shape: f32[8,16], index: 6, kind: input, shape index: {}]   ;;  %s699_s7 = inlined_call_operand.vmem [shape: f32[8,1], index: 7, kind: input, shape index: {}]   ;;  %s700_s8 = inlined_call_operand.vmem [shape: f32[2,8], index: 8, kind: input, shape index: {}]   ;;  %s701_s9 = inlined_call_operand.vmem [shape: f32[2,1], index: 9, kind: input, shape index: {}]   ;;  %s702_s10 = inlined_call_operand.hbm [shape: f32[2,128], index: 10, kind: output, shape index: {}]  }
   0x1   :  { %v36_v0 = vld [vmem:[%s693_s1] sm:$0x7]  ;;  %v38_v2 = vld [vmem:[%s694_s2 + $0x8] sm:$0xff]  ;;  %v39_v3 = vld [vmem:[%s694_s2 + $0x10] sm:$0xff]  ;;  %534 = vset.pattern.permute.xlu0 %v560_v5  ;;  %535 = vset.pattern.permute.xlu1 %v560_v5 }
   0x2   :  { %v37_v1 = vld [vmem:[%s694_s2] sm:$0xff]  ;;  %487 = vmatprep.subr.msk.mxu0 %vm78_vm0, %v36_v0  ;;  %v43_v6 = vld [vmem:[%s695_s3 + $0x10] sm:$0xff]  ;;  %v40_v7 = vld [vmem:[%s694_s2 + $0x18] sm:$0xff] }
   0x3   :  { %489 = vmatprep.mubr.msk.f32.mxu0 %vm65_vm1, %v37_v1  ;;  %v41_v4 = vld [vmem:[%s695_s3] sm:$0xff]  ;;  %488 = vmatpush3.msk.msra.mxu0 %vm78_vm0, %v36_v0  ;;  %v42_v8 = vld [vmem:[%s695_s3 + $0x8] sm:$0xff] }
   0x4   :  { %490 = vmatmul.mubr.msk.f32.vlgmr.msra.gmra.mrb[0].mxu0 %vm65_vm1, %v38_v2  ;;  %47 = vperm.xlu0 %534, %v41_v4  }
   0x5   :  { %492 = vmatprep.mubr.msk.f32.mxu0 %vm65_vm1, %v39_v3 }
   0x6   :  { %16 = vsyncpa [#allocation5], 0  ;;  %57 = vperm.xlu1 %535, %v43_v6   ;;  %v44_v9 = vld [vmem:[%s695_s3 + $0x18] sm:$0xff]  ;;  %v182_v10 = vld [vmem:[%s697_s5] sm:$0xff]  ;;  %vm194_vm2 = vcmask 261120   ;;  %v171_v19 = vstv %s692_s0  ;;  %v561_v39 = vmov 0.0|0.0  }
   0x7   :  { %v183_v11 = vld [vmem:[%s697_s5 + $0x8] sm:$0xff]  ;;  %v283_v12 = vld [vmem:[%s699_s7] sm:$0xff]  ;;  %526 = vmatprep.subr.bf16.mxu0 %v561_v39  ;;  %vm562_vm7 = vmmov 0   ;;  %v563_v40 = vmov 0.0   ;;  %vm289_vm10 = vcmask 130048   ;;  %vm373_vm12 = vcmask 64512  }
   0x8   :  { %493 = vmatmul.mubr.msk.f32.gmra.mrb[2].mxu0 %vm65_vm1, %v40_v7  ;;  %52 = vperm.xlu0 %534, %v42_v8   ;;  %v367_v13 = vld [vmem:[%s701_s9] sm:$0x3]  ;;  %v181_v38 = vld [vmem:[%s696_s4 + $0x8] sm:$0xff]  ;;  %s564_s21 = smov [#allocation4]  }
   0x9   :  { %v180_v14 = vld [vmem:[%s696_s4] sm:$0xff]  ;;  %510 = vmatprep.mubr.msk.f32.mxu0 %vm562_vm7, %v563_v40  ;;  %s454_s22 = sshll.u32 %s564_s21, 4  ;;  %s455_s22 = int_to_ptr.vmem [resolvable:$true] %s454_s22 }
   0xa   :  { %62 = vperm.xlu1 %535, %v44_v9   ;;  %503 = vmatprep.mubr.msk.f32.mxu1 %vm194_vm2, %v180_v14  ;;  %v282_v52 = vld [vmem:[%s698_s6] sm:$0xff]  ;;  %s536_s6 = scalar_lea.vmem %s455_s22, 32  ;;  %p541_p1 = scmp.lt.s32.totalorder %s455_s22, %s455_s22 }
   0xb   :  { %v366_v58 = vld [vmem:[%s700_s8] sm:$0x3]  ;;  %p537_p0 = scmp.ne.s32.totalorder %s455_s22, %s536_s6  ;;  %p542_p2 = scmp.lt.s32.totalorder %s536_s6, %s536_s6 }
   0xc   :  { %186 = vperm.xlu0 %534, %v182_v10  }
   0xd   :  { %p543_p3 = por %p542_p2, %p541_p1 }
   0xe   :  { %191 = vperm.xlu1 %535, %v183_v11  }
   0xf   :  { %p544_p4 = pnand %p543_p3, %p537_p0 }
  0x10   :  { %286 = vperm.xlu0 %534, %v283_v12  }
  0x12   :  { %370 = vperm.xlu1 %535, %v367_v13  }
  0x83   :  { %v48_v15 = vpop.permute.xlu0 %47 }
  0x85   :  { %v58_v16 = vpop.permute.xlu1 %57 }
  0x87   :  { %v53_v17 = vpop.permute.xlu0 %52 }
  0x89   :  { %v63_v24 = vpop.permute.xlu1 %62 }
  0x8b   :  { %v187_v43 = vpop.permute.xlu0 %186 }
  0x8d   :  { %v192_v41 = vpop.permute.xlu1 %191 }
  0x8f   :  { %v287_v53 = vpop.permute.xlu0 %286 }
  0x91   :  { %v371_v60 = vpop.permute.xlu1 %370 }
  0xd7   :  { %v491_v18 = vpop.f32.mrb[0].mxu0 }
  0xd8   :  { %v154_v20 = vadd.f32 %v491_v18, %v53_v17  ;;  %v148_v21 = vpop.f32.mrb[1].mxu0 }
  0xd9   :  { %v149_v22 = vadd.f32 %v148_v21, %v48_v15 }
  0xda   :  { %v173_v23 = vmul.f32 %v171_v19, %v154_v20  ;;  %vm168_vm3 = vcmp.ge.f32.partialorder %v154_v20, 0.0 }
  0xdb   :  { %v172_v25 = vmul.f32 %v171_v19, %v149_v22  ;;  %v494_v26 = vpop.f32.mrb[2].mxu0  ;;  %vm167_vm4 = vcmp.ge.f32.partialorder %v149_v22, 0.0 }
  0xdc   :  { %v164_v27 = vadd.f32 %v494_v26, %v63_v24  ;;  %v158_v28 = vpop.f32.mrb[3].mxu0  ;;  %v177_v29 = vsel %vm168_vm3, %v154_v20, %v173_v23 }
  0xdd   :  { %v159_v30 = vadd.f32 %v158_v28, %v58_v16  ;;  %v176_v31 = vsel %vm167_vm4, %v149_v22, %v172_v25 }
  0xde   :  { %vm170_vm5 = vcmp.ge.f32.partialorder %v164_v27, 0.0  ;;  %v175_v32 = vmul.f32 %v171_v19, %v164_v27  ;;  %v518_v33 = vpack.c.bf16 %v177_v29, %v176_v31 }
  0xdf   :  { %vm169_vm6 = vcmp.ge.f32.partialorder %v159_v30, 0.0  ;;  %v174_v34 = vmul.f32 %v171_v19, %v159_v30 }
  0xe0   :  { %519 = vmatprep.subr.bf16.mxu1 %v518_v33  ;;  %v179_v35 = vsel %vm170_vm5, %v164_v27, %v175_v32 }
  0xe1   :  { %521 = vmatpush3.bf16.msra.mxu1 %v518_v33  ;;  %v178_v36 = vsel %vm169_vm6, %v159_v30, %v174_v34 }
  0xe2   :  { %v522_v37 = vpack.c.bf16 %v179_v35, %v178_v36 }
  0xe4   :  { %523 = vmatprep.subr.bf16.mxu1 %v522_v37 }
  0xe5   :  { %525 = vmatpush3.bf16.msra.mxu1 %v522_v37 }
  0xe6   :  { %513 = vmatprep.subr.mxu1 %v563_v40 }
  0xe8   :  { %504 = vmatmul.mubr.msk.f32.vlgmr.msra.gmra.mrb[0].mxu1 %vm194_vm2, %v181_v38 }
  0xe9   :  { %515 = vmatprep.mubr.msk.f32.mxu1 %vm562_vm7, %v563_v40 }
 0x1bb   :  { %v505_v42 = vpop.f32.mrb[0].mxu1 }
 0x1bc   :  { %v273_v44 = vadd.f32 %v505_v42, %v192_v41  ;;  %v267_v45 = vpop.f32.mrb[1].mxu1 }
 0x1bd   :  { %v268_v46 = vadd.f32 %v267_v45, %v187_v43 }
 0x1be   :  { %vm277_vm8 = vcmp.ge.f32.partialorder %v273_v44, 0.0  ;;  %v279_v47 = vmul.f32 %v273_v44, %v171_v19 }
 0x1bf   :  { %vm276_vm9 = vcmp.ge.f32.partialorder %v268_v46, 0.0  ;;  %v278_v48 = vmul.f32 %v268_v46, %v171_v19 }
 0x1c0   :  { %v281_v49 = vsel %vm277_vm8, %v273_v44, %v279_v47 }
 0x1c1   :  { %v280_v50 = vsel %vm276_vm9, %v268_v46, %v278_v48 }
 0x1c2   :  { %v527_v51 = vpack.c.bf16 %v281_v49, %v280_v50 }
 0x1c4   :  { %528 = vmatpush3.bf16.msra.mxu0 %v527_v51 }
 0x1c7   :  { %511 = vmatmul.mubr.msk.f32.vlgmr.msra.gmra.mrb[4].mxu0 %vm289_vm10, %v282_v52 }
 0x29a   :  { %v359_v54 = vpop.f32.mrb[4].mxu0 }
 0x29b   :  { %v360_v55 = vadd.f32 %v359_v54, %v287_v53  ;;  %v512_v56 = vpop.f32.mrb[5].mxu0 }
 0x29d   :  { %vm363_vm11 = vcmp.ge.f32.partialorder %v360_v55, 0.0  ;;  %v364_v57 = vmul.f32 %v360_v55, %v171_v19 }
 0x29f   :  { %v365_v59 = vsel %vm363_vm11, %v360_v55, %v364_v57 }
 0x2a0   :  { %514 = vmatpush3.msra.mxu1 %v365_v59 }
 0x2a1   :  { %516 = vmatmul.mubr.msk.f32.vlgmr.msra.gmra.mrb[2].mxu1 %vm373_vm12, %v366_v58 }
 0x374   :  { %v443_v61 = vpop.f32.mrb[2].mxu1 }
 0x375   :  { %v444_v62 = vadd.f32 %v443_v61, %v371_v60  ;;  %v517_v63 = vpop.f32.mrb[3].mxu1 }
 0x377   :  { %447 = vst [vmem:[#allocation4] sm:$0x3] %v444_v62 }
 0x378   :  { %547 = shalt.err (!%p544_p4)
}
 0x379   :  { %s548_s23 = scalar_lea.hbm %s702_s10, 32 }
 0x37a   :  { %p549_p5 = scmp.ne.s32.totalorder %s702_s10, %s548_s23  ;;  %p552_p6 = scmp.lt.u32.totalorder %s548_s23, %s702_s10 }
 0x37c   :  { %p554_p7 = pnand %p552_p6, %p549_p5 }
 0x37e   :  { %557 = shalt.err (!%p554_p7)
}
 0x37f   :  { %457 = dma.vmem_to_hbm [thread:$0]  %s455_s22, 32, %s702_s10, [#allocation5]  }
 0x380   :  { %558 = dma.done.wait [#allocation5], 32  }
 0x381   :  { %559 = vsyncadd [#allocation5], 4294967264 }
 0x382   :  { %461 = vsyncpa [#allocation5], 1 }

</bundles_post_ra>
